<compile_context>
chip_gen: v5e
topology: v5e:2x2
jax: 0.10.0
libtpu: 0.0.40
codegen_flags: <defaults>
</compile_context>

<pallas_src>
import functools

import jax
import jax.numpy as jnp
from jax.experimental import pallas as pl
from jax.experimental.pallas import tpu as pltpu


# -----------------------------------------------------------------------------
# Kernel
# -----------------------------------------------------------------------------
def _autoencoder_kernel(x_ref,
                        w1_ref, b1_ref,
                        w2_ref, b2_ref,
                        w3_ref, b3_ref,   # BN already folded into w3/b3
                        w4_ref, b4_ref,
                        enc_ref, dec_ref):
    cdt = w1_ref.dtype            # matmul operand dtype (f32 or bf16)
    x = x_ref[...]                # (TB, Dp), already in cdt (host-side cast)

    # ---- encoder ----
    h = jnp.dot(x, w1_ref[...],
                preferred_element_type=jnp.float32) + b1_ref[...]
    h = jnp.maximum(h, 0.0)                       # ReLU (f32 on VPU)
    # Dropout: identity in eval mode.
    enc = jnp.dot(h.astype(cdt), w2_ref[...],
                  preferred_element_type=jnp.float32) + b2_ref[...]
    enc_ref[...] = enc

    # ---- decoder ----  (BatchNorm running-stats folded into w3/b3)
    d = jnp.dot(enc.astype(cdt), w3_ref[...],
                preferred_element_type=jnp.float32) + b3_ref[...]
    d = jnp.maximum(d, 0.0)                       # ReLU
    dec = jnp.dot(d.astype(cdt), w4_ref[...],
                  preferred_element_type=jnp.float32) + b4_ref[...]
    dec_ref[...] = dec


# -----------------------------------------------------------------------------
# Host wrapper
# -----------------------------------------------------------------------------
_VMEM_CAP = 48 << 20   # stay well under v7x's 64 MiB/TC (fine on v5e/v6e too)


def _round_up(n, m):
    return ((n + m - 1) // m) * m


def _pad_feature_dim(n):
    # <=128 -> 128 lane width; >128 -> multiple of 256 for the 256-wide MXU.
    return 128 if n <= 128 else _round_up(n, 256)


def _pad2(a, rows, cols):
    return jnp.pad(a, ((0, rows - a.shape[0]), (0, cols - a.shape[1])))


def _nbytes(shape, dtype):
    n = 1
    for s in shape:
        n *= s
    return n * jnp.dtype(dtype).itemsize


@functools.partial(jax.jit, static_argnames=("compute_dtype", "block_batch"))
def autoencoder_forward(x, params, *, compute_dtype=jnp.float32, block_batch=512):
    """Eval-mode forward of the Autoencoder. Returns (encoded, decoded)."""
    (w1, b1, w2, b2, w3, b3, w4, b4,
     gamma, beta, run_mean, run_var) = params
    eps = 1e-5

    # Fold eval-mode BatchNorm1d into the third Linear (host-side, zero cost).
    bn_scale = gamma / jnp.sqrt(run_var + eps)           # (1, H)
    bn_shift = beta - run_mean * bn_scale                # (1, H)
    w3f = w3 * bn_scale                                  # (E, H) * (1, H)
    b3f = b3 * bn_scale + bn_shift                       # (1, H)

    B, D_in = x.shape
    H = w1.shape[1]
    E = w2.shape[1]

    # Lane/MXU-friendly padded feature dims.
    Dp = _pad_feature_dim(D_in)
    Hp = _pad_feature_dim(H)
    Ep = _pad_feature_dim(E)

    # Matmul-operand dtype, with a weight-size guard so the resident weights
    # always fit comfortably in VMEM (binding on v7x's 64 MiB/TC).
    cdt = jnp.dtype(compute_dtype)
    est_weight_elems = Dp * Hp + Hp * Ep + Ep * Hp + Hp * Dp
    if est_weight_elems * cdt.itemsize > int(0.6 * _VMEM_CAP):
        cdt = jnp.dtype(jnp.bfloat16)   # keep weights VMEM-resident

    # Batch tile: multiple of 8 sublanes, capped by block_batch, and capped at
    # ceil(B/2) when B >= 16 so there are always >= 2 grid tiles (megacore
    # sharding on v7x + DMA/compute overlap on all generations).
    TB = _round_up(min(B, block_batch), 8)
    if B >= 16:
        TB = min(TB, _round_up(-(-B // 2), 8))
    Bp = _round_up(B, TB)

    # Zero-padding preserves the real outputs exactly (padded lanes stay 0).
    xp = _pad2(x.astype(cdt), Bp, Dp)                     # batch-tiled input in cdt
    w1p = _pad2(w1, Dp, Hp).astype(cdt)
    b1p = _pad2(b1, 1, Hp).astype(jnp.float32)
    w2p = _pad2(w2, Hp, Ep).astype(cdt)
    b2p = _pad2(b2, 1, Ep).astype(jnp.float32)
    w3p = _pad2(w3f, Ep, Hp).astype(cdt)
    b3p = _pad2(b3f, 1, Hp).astype(jnp.float32)
    w4p = _pad2(w4, Hp, Dp).astype(cdt)
    b4p = _pad2(b4, 1, Dp).astype(jnp.float32)

    inputs = (xp, w1p, b1p, w2p, b2p, w3p, b3p, w4p, b4p)

    grid = (Bp // TB,)

    # Resident weights/biases: constant index_map + single buffer (no point
    # double-buffering a block that never changes).
    def _resident(shape):
        return pl.BlockSpec(shape, lambda b: (0, 0), pipeline_mode=pl.Buffered(1))

    in_specs = [
        pl.BlockSpec((TB, Dp), lambda b: (b, 0)),   # x (tiled over batch)
        _resident((Dp, Hp)),                        # w1
        _resident((1, Hp)),                         # b1
        _resident((Hp, Ep)),                        # w2
        _resident((1, Ep)),                         # b2
        _resident((Ep, Hp)),                        # w3 (BN folded)
        _resident((1, Hp)),                         # b3 (BN folded)
        _resident((Hp, Dp)),                        # w4
        _resident((1, Dp)),                         # b4
    ]
    out_specs = (
        pl.BlockSpec((TB, Ep), lambda b: (b, 0)),   # encoded (lane-dense)
        pl.BlockSpec((TB, Dp), lambda b: (b, 0)),   # decoded (lane-dense)
    )
    out_shape = (
        jax.ShapeDtypeStruct((Bp, Ep), jnp.float32),
        jax.ShapeDtypeStruct((Bp, Dp), jnp.float32),
    )

    # VMEM budget: weights counted once (Buffered(1)); only the batch-tiled
    # x and the two outputs are double-buffered by the pipeline.
    weight_bytes = sum(_nbytes(a.shape, a.dtype) for a in inputs[1:])
    stream_bytes = 2 * (_nbytes((TB, Dp), cdt)
                        + _nbytes((TB, Ep), jnp.float32)
                        + _nbytes((TB, Dp), jnp.float32))
    vmem_limit = int(min(_VMEM_CAP,
                         max(8 << 20, weight_bytes + stream_bytes + (2 << 20))))

    # CostEstimate from the real (unpadded) problem, not the padded one.
    flops = 2 * B * (D_in * H + H * E + E * H + H * D_in)
    bytes_accessed = (
        _nbytes((B, D_in), cdt)
        + (D_in * H + H * E + E * H + H * D_in) * cdt.itemsize
        + (H + E + H + D_in) * 4
        + _nbytes((B, E), jnp.float32)
        + _nbytes((B, D_in), jnp.float32)
    )

    enc_p, dec_p = pl.pallas_call(
        _autoencoder_kernel,
        grid=grid,
        in_specs=in_specs,
        out_specs=out_specs,
        out_shape=out_shape,
        compiler_params=pltpu.CompilerParams(
            dimension_semantics=("parallel",),     # shard batch tiles across TCs
            vmem_limit_bytes=vmem_limit,
        ),
        cost_estimate=pl.CostEstimate(
            flops=flops, transcendentals=0, bytes_accessed=bytes_accessed),
    )(*inputs)

    # Slice padded rows / lanes back off.
    return enc_p[:B, :E], dec_p[:B, :D_in]


# -----------------------------------------------------------------------------
# Parameter init (PyTorch-style Linear init; BN at its default init)
# -----------------------------------------------------------------------------
def init_params(key, input_dim, encoding_dim, hidden_dim):
    """Linear weights stored transposed as (in, out) so the kernel does x @ W + b."""
    def linear(k, fan_in, fan_out):
        kw, kb = jax.random.split(k)
        bound = 1.0 / jnp.sqrt(fan_in)
        w = jax.random.uniform(kw, (fan_in, fan_out), jnp.float32, -bound, bound)
        b = jax.random.uniform(kb, (1, fan_out), jnp.float32, -bound, bound)
        return w, b

    k1, k2, k3, k4 = jax.random.split(key, 4)
    w1, b1 = linear(k1, input_dim, hidden_dim)     # encoder Linear 1
    w2, b2 = linear(k2, hidden_dim, encoding_dim)  # encoder Linear 2
    w3, b3 = linear(k3, encoding_dim, hidden_dim)  # decoder Linear 1
    w4, b4 = linear(k4, hidden_dim, input_dim)     # decoder Linear 2

    # BatchNorm1d(hidden_dim) default init / eval-mode running statistics.
    gamma = jnp.ones((1, hidden_dim), jnp.float32)
    beta = jnp.zeros((1, hidden_dim), jnp.float32)
    run_mean = jnp.zeros((1, hidden_dim), jnp.float32)
    run_var = jnp.ones((1, hidden_dim), jnp.float32)

    return (w1, b1, w2, b2, w3, b3, w4, b4, gamma, beta, run_mean, run_var)


# -----------------------------------------------------------------------------
# Demo / self-check
# -----------------------------------------------------------------------------
if __name__ == "__main__":
    batch = 32            # >=16 -> grid of 2 batch tiles (exercises pipelining)
    input_dim = 32
    encoding_dim = 8
    hidden_dim = 32
    # dropout_rate is identity in eval mode.

    key = jax.random.PRNGKey(0)
    kx, kp = jax.random.split(key)
    x = jax.random.normal(kx, (batch, input_dim), jnp.float32)
    params = init_params(kp, input_dim, encoding_dim, hidden_dim)

    # Pure-JAX eval-mode reference.
    (w1, b1, w2, b2, w3, b3, w4, b4, gamma, beta, run_mean, run_var) = params
    eps = 1e-5
    bn_scale = gamma / jnp.sqrt(run_var + eps)
    bn_shift = beta - run_mean * bn_scale
    h = jnp.maximum(x @ w1 + b1, 0.0)
    enc_ref = h @ w2 + b2
    d = jnp.maximum((enc_ref @ w3 + b3) * bn_scale + bn_shift, 0.0)
    dec_ref = d @ w4 + b4

    # f32 path: exact module semantics.
    encoded, decoded = autoencoder_forward(x, params, compute_dtype=jnp.float32)
    jax.block_until_ready((encoded, decoded))
    assert encoded.shape == (batch, encoding_dim)
    assert decoded.shape == (batch, input_dim)
    assert jnp.allclose(encoded, enc_ref, atol=1e-5, rtol=1e-5)
    assert jnp.allclose(decoded, dec_ref, atol=1e-5, rtol=1e-5)

    # bf16 matmul-operand path (MXU-friendly on v6e/v7x) — looser tolerance.
    encoded16, decoded16 = autoencoder_forward(x, params, compute_dtype=jnp.bfloat16)
    jax.block_until_ready((encoded16, decoded16))
    assert jnp.allclose(encoded16, enc_ref, atol=1e-1, rtol=1e-1)
    assert jnp.allclose(decoded16, dec_ref, atol=1e-1, rtol=1e-1)

    print("KERNEL_OK")
</pallas_src>

<mosaic_0001>
module attributes {stable_mosaic.version = 11 : i64} {
  func.func @_autoencoder_kernel(%arg0: i32, %arg1: memref<16x128xf32, #tpu.memory_space<vmem>>, %arg2: memref<128x128xf32, #tpu.memory_space<vmem>>, %arg3: memref<1x128xf32, #tpu.memory_space<vmem>>, %arg4: memref<128x128xf32, #tpu.memory_space<vmem>>, %arg5: memref<1x128xf32, #tpu.memory_space<vmem>>, %arg6: memref<128x128xf32, #tpu.memory_space<vmem>>, %arg7: memref<1x128xf32, #tpu.memory_space<vmem>>, %arg8: memref<128x128xf32, #tpu.memory_space<vmem>>, %arg9: memref<1x128xf32, #tpu.memory_space<vmem>>, %arg10: memref<16x128xf32, #tpu.memory_space<vmem>>, %arg11: memref<16x128xf32, #tpu.memory_space<vmem>>) attributes {dimension_semantics = [#tpu.dimension_semantics<parallel>], iteration_bounds = array<i64: 2>, scalar_prefetch = 0 : i64, scratch_operands = 0 : i64, tpu.core_type = #tpu.core_type<tc>, window_params = [{transform_indices = @transform_0, window_bounds = array<i64: 16, 128>}, {pipeline_mode = #tpu.pipeline_mode<synchronous>, transform_indices = @transform_1, window_bounds = array<i64: 128, 128>}, {pipeline_mode = #tpu.pipeline_mode<synchronous>, transform_indices = @transform_2, window_bounds = array<i64: 1, 128>}, {pipeline_mode = #tpu.pipeline_mode<synchronous>, transform_indices = @transform_3, window_bounds = array<i64: 128, 128>}, {pipeline_mode = #tpu.pipeline_mode<synchronous>, transform_indices = @transform_4, window_bounds = array<i64: 1, 128>}, {pipeline_mode = #tpu.pipeline_mode<synchronous>, transform_indices = @transform_5, window_bounds = array<i64: 128, 128>}, {pipeline_mode = #tpu.pipeline_mode<synchronous>, transform_indices = @transform_6, window_bounds = array<i64: 1, 128>}, {pipeline_mode = #tpu.pipeline_mode<synchronous>, transform_indices = @transform_7, window_bounds = array<i64: 128, 128>}, {pipeline_mode = #tpu.pipeline_mode<synchronous>, transform_indices = @transform_8, window_bounds = array<i64: 1, 128>}, {transform_indices = @transform_9, window_bounds = array<i64: 16, 128>}, {transform_indices = @transform_10, window_bounds = array<i64: 16, 128>}]} {
    %c0 = arith.constant 0 : index
    %c0_0 = arith.constant 0 : index
    %0 = vector.load %arg1[%c0, %c0_0] : memref<16x128xf32, #tpu.memory_space<vmem>>, vector<16x128xf32>
    %c0_1 = arith.constant 0 : index
    %c0_2 = arith.constant 0 : index
    %1 = vector.load %arg2[%c0_1, %c0_2] : memref<128x128xf32, #tpu.memory_space<vmem>>, vector<128x128xf32>
    %cst = arith.constant dense<0.000000e+00> : vector<16x128xf32>
    %2 = tpu.matmul %0, %1, %cst {dimension_numbers = #tpu.dot_dimension_numbers<[1], [0], [0], [1], [0, 0, 1, 1], [], []>} : vector<16x128xf32>, vector<128x128xf32>, vector<16x128xf32> -> vector<16x128xf32>
    %c0_3 = arith.constant 0 : index
    %c0_4 = arith.constant 0 : index
    %3 = vector.load %arg3[%c0_3, %c0_4] : memref<1x128xf32, #tpu.memory_space<vmem>>, vector<1x128xf32>
    %4 = vector.broadcast %3 : vector<1x128xf32> to vector<16x128xf32>
    %5 = arith.addf %2, %4 : vector<16x128xf32>
    %cst_5 = arith.constant 0.000000e+00 : f32
    %6 = vector.broadcast %cst_5 : f32 to vector<16x128xf32>
    %7 = arith.maximumf %5, %6 : vector<16x128xf32>
    %c0_6 = arith.constant 0 : index
    %c0_7 = arith.constant 0 : index
    %8 = vector.load %arg4[%c0_6, %c0_7] : memref<128x128xf32, #tpu.memory_space<vmem>>, vector<128x128xf32>
    %cst_8 = arith.constant dense<0.000000e+00> : vector<16x128xf32>
    %9 = tpu.matmul %7, %8, %cst_8 {dimension_numbers = #tpu.dot_dimension_numbers<[1], [0], [0], [1], [0, 0, 1, 1], [], []>} : vector<16x128xf32>, vector<128x128xf32>, vector<16x128xf32> -> vector<16x128xf32>
    %c0_9 = arith.constant 0 : index
    %c0_10 = arith.constant 0 : index
    %10 = vector.load %arg5[%c0_9, %c0_10] : memref<1x128xf32, #tpu.memory_space<vmem>>, vector<1x128xf32>
    %11 = vector.broadcast %10 : vector<1x128xf32> to vector<16x128xf32>
    %12 = arith.addf %9, %11 : vector<16x128xf32>
    %c0_11 = arith.constant 0 : index
    %c0_12 = arith.constant 0 : index
    %13 = vector.load %arg10[%c0_11, %c0_12] : memref<16x128xf32, #tpu.memory_space<vmem>>, vector<16x128xf32>
    tpu.vector_store %arg10[%c0_11, %c0_12], %12 {strides = array<i32>} : memref<16x128xf32, #tpu.memory_space<vmem>>, vector<16x128xf32>,
    %c0_13 = arith.constant 0 : index
    %c0_14 = arith.constant 0 : index
    %14 = vector.load %arg6[%c0_13, %c0_14] : memref<128x128xf32, #tpu.memory_space<vmem>>, vector<128x128xf32>
    %cst_15 = arith.constant dense<0.000000e+00> : vector<16x128xf32>
    %15 = tpu.matmul %12, %14, %cst_15 {dimension_numbers = #tpu.dot_dimension_numbers<[1], [0], [0], [1], [0, 0, 1, 1], [], []>} : vector<16x128xf32>, vector<128x128xf32>, vector<16x128xf32> -> vector<16x128xf32>
    %c0_16 = arith.constant 0 : index
    %c0_17 = arith.constant 0 : index
    %16 = vector.load %arg7[%c0_16, %c0_17] : memref<1x128xf32, #tpu.memory_space<vmem>>, vector<1x128xf32>
    %17 = vector.broadcast %16 : vector<1x128xf32> to vector<16x128xf32>
    %18 = arith.addf %15, %17 : vector<16x128xf32>
    %cst_18 = arith.constant 0.000000e+00 : f32
    %19 = vector.broadcast %cst_18 : f32 to vector<16x128xf32>
    %20 = arith.maximumf %18, %19 : vector<16x128xf32>
    %c0_19 = arith.constant 0 : index
    %c0_20 = arith.constant 0 : index
    %21 = vector.load %arg8[%c0_19, %c0_20] : memref<128x128xf32, #tpu.memory_space<vmem>>, vector<128x128xf32>
    %cst_21 = arith.constant dense<0.000000e+00> : vector<16x128xf32>
    %22 = tpu.matmul %20, %21, %cst_21 {dimension_numbers = #tpu.dot_dimension_numbers<[1], [0], [0], [1], [0, 0, 1, 1], [], []>} : vector<16x128xf32>, vector<128x128xf32>, vector<16x128xf32> -> vector<16x128xf32>
    %c0_22 = arith.constant 0 : index
    %c0_23 = arith.constant 0 : index
    %23 = vector.load %arg9[%c0_22, %c0_23] : memref<1x128xf32, #tpu.memory_space<vmem>>, vector<1x128xf32>
    %24 = vector.broadcast %23 : vector<1x128xf32> to vector<16x128xf32>
    %25 = arith.addf %22, %24 : vector<16x128xf32>
    %c0_24 = arith.constant 0 : index
    %c0_25 = arith.constant 0 : index
    %26 = vector.load %arg11[%c0_24, %c0_25] : memref<16x128xf32, #tpu.memory_space<vmem>>, vector<16x128xf32>
    tpu.vector_store %arg11[%c0_24, %c0_25], %25 {strides = array<i32>} : memref<16x128xf32, #tpu.memory_space<vmem>>, vector<16x128xf32>,
    return
  }
  func.func @transform_0(%arg0: i32) -> (i32, i32) {
    %c0_i32 = arith.constant 0 : i32
    %c0_i32_0 = arith.constant 0 : i32
    return %arg0, %c0_i32 : i32, i32
  }
  func.func @transform_1(%arg0: i32) -> (i32, i32) {
    %c0_i32 = arith.constant 0 : i32
    %c0_i32_0 = arith.constant 0 : i32
    %c0_i32_1 = arith.constant 0 : i32
    return %c0_i32, %c0_i32_0 : i32, i32
  }
  func.func @transform_2(%arg0: i32) -> (i32, i32) {
    %c0_i32 = arith.constant 0 : i32
    %c0_i32_0 = arith.constant 0 : i32
    %c0_i32_1 = arith.constant 0 : i32
    return %c0_i32, %c0_i32_0 : i32, i32
  }
  func.func @transform_3(%arg0: i32) -> (i32, i32) {
    %c0_i32 = arith.constant 0 : i32
    %c0_i32_0 = arith.constant 0 : i32
    %c0_i32_1 = arith.constant 0 : i32
    return %c0_i32, %c0_i32_0 : i32, i32
  }
  func.func @transform_4(%arg0: i32) -> (i32, i32) {
    %c0_i32 = arith.constant 0 : i32
    %c0_i32_0 = arith.constant 0 : i32
    %c0_i32_1 = arith.constant 0 : i32
    return %c0_i32, %c0_i32_0 : i32, i32
  }
  func.func @transform_5(%arg0: i32) -> (i32, i32) {
    %c0_i32 = arith.constant 0 : i32
    %c0_i32_0 = arith.constant 0 : i32
    %c0_i32_1 = arith.constant 0 : i32
    return %c0_i32, %c0_i32_0 : i32, i32
  }
  func.func @transform_6(%arg0: i32) -> (i32, i32) {
    %c0_i32 = arith.constant 0 : i32
    %c0_i32_0 = arith.constant 0 : i32
    %c0_i32_1 = arith.constant 0 : i32
    return %c0_i32, %c0_i32_0 : i32, i32
  }
  func.func @transform_7(%arg0: i32) -> (i32, i32) {
    %c0_i32 = arith.constant 0 : i32
    %c0_i32_0 = arith.constant 0 : i32
    %c0_i32_1 = arith.constant 0 : i32
    return %c0_i32, %c0_i32_0 : i32, i32
  }
  func.func @transform_8(%arg0: i32) -> (i32, i32) {
    %c0_i32 = arith.constant 0 : i32
    %c0_i32_0 = arith.constant 0 : i32
    %c0_i32_1 = arith.constant 0 : i32
    return %c0_i32, %c0_i32_0 : i32, i32
  }
  func.func @transform_9(%arg0: i32) -> (i32, i32) {
    %c0_i32 = arith.constant 0 : i32
    %c0_i32_0 = arith.constant 0 : i32
    return %arg0, %c0_i32 : i32, i32
  }
  func.func @transform_10(%arg0: i32) -> (i32, i32) {
    %c0_i32 = arith.constant 0 : i32
    %c0_i32_0 = arith.constant 0 : i32
    return %arg0, %c0_i32 : i32, i32
  }
}

</mosaic_0001>

<bundles_post_ra>
// kernel: autoencoder_forward.1
= control target key start
LH: loop header
LB: loop body
LE: loop exit
PB: predicated region body
PF: predicated region fallthrough
CT: control target
= control target key end

     0   :  { %16 = vsyncpa [#allocation3], 0  ;;  %s1148_s0 = inlined_call_operand.vmem [shape: f32[32,128], index: 0, kind: input, shape index: {}]   ;;  %s1149_s1 = inlined_call_operand.vmem [shape: f32[128,128], index: 1, kind: input, shape index: {}]   ;;  %s1150_s2 = inlined_call_operand.vmem [shape: f32[1,128], index: 2, kind: input, shape index: {}]   ;;  %s1151_s3 = inlined_call_operand.vmem [shape: f32[128,128], index: 3, kind: input, shape index: {}]   ;;  %s1152_s4 = inlined_call_operand.vmem [shape: f32[1,128], index: 4, kind: input, shape index: {}]   ;;  %s1153_s5 = inlined_call_operand.vmem [shape: f32[128,128], index: 5, kind: input, shape index: {}]   ;;  %s1154_s6 = inlined_call_operand.vmem [shape: f32[1,128], index: 6, kind: input, shape index: {}]   ;;  %s1155_s7 = inlined_call_operand.vmem [shape: f32[128,128], index: 7, kind: input, shape index: {}]   ;;  %s1156_s8 = inlined_call_operand.vmem [shape: f32[1,128], index: 8, kind: input, shape index: {}]   ;;  %s1157_s9 = inlined_call_operand.vmem [shape: f32[32,128], index: 9, kind: output, shape index: {0}]   ;;  %s1158_s10 = inlined_call_operand.hbm [shape: f32[32,128], index: 10, kind: output, shape index: {1}]  }
   0x1   :  { %18 = vsyncpa [#allocation3 + $0x1], 0  ;;  %s850_s13 = smov 0   ;;  %s852_s14 = smov 0  }
   0x2   :  { %s854_s15 = smov 0   ;;  %s856_s16 = smov 0  }
   0x3 LB: > { %1160 = sst [smem:[#allocation5_spill]] %s787_s15  ;;  %s871_s17 = sadd.s32 4294967295, %s791_s16   ;;  %s791_s16 = sphi %s856_s16, %s1168_s16   ;;  %s787_s15 = sphi %s854_s15, %s1165_s15   ;;  %s783_s14 = sphi %s852_s14, %s1167_s14   ;;  %s779_s13 = sphi %s850_s13, %s1166_s13  }
   0x4   : > { %s669_s18 = sadd.s32 4294967294, %s791_s16   ;;  %s875_s19 = sadd.s32 1, %s791_s16  }
   0x5   : > { %s251_s20 = sadd.s32 1, %s787_s15  ;;  %s248_s21 = ssub.s32 %s791_s16, %s875_s19 }
   0x6   : > { %p261_p0 = scmp.ne.s32.totalorder %s787_s15, %s783_s14  ;;  %p249_p1 = scmp.eq.s32.totalorder %s248_s21, 0 }
   0x7   : > { %p262_p2 = scmp.eq.s32.totalorder %s871_s17, 1  ;;  %p267_p3 = scmp.ne.s32.totalorder %s783_s14, %s779_s13 }
   0x8   : > { %p268_p4 = scmp.eq.s32.totalorder %s669_s18, 1  ;;  %p672_p7 = scmp.ge.s32.totalorder %s791_s16, 1 }
   0x9   : > { %s886_s22 = scalar_select %p249_p1, %s787_s15, %s251_s20  }
   0xa   : > { %p888_p5 = por %p262_p2, %p261_p0  ;;  %p892_p6 = por %p268_p4, %p267_p3 }
   0xb   : > { %1161 = sst [smem:[#allocation6_spill]] %s886_s22  ;;  %p319_p8 = scmp.lt.s32.totalorder %s791_s16, 3 }
   0xd   : > { %p320_p9 = pnand %p672_p7, %p319_p8 }
   0xe   : > { %s674_s25 = sshll.u32 (!%p320_p9), %s871_s17, 1  ;;  %s359_s15 = sand.u32 (!%p320_p9), 1, %s783_s14  }
   0xf   : > { %323 = sbr.rel (%p320_p9) target bundleno = 592 (0x250), region = 56  ;;  %p363_p10 = scmp.lt.s32.totalorder (!%p320_p9), %s674_s25, 3 }
  0x10   : > { %s673_s22 = sshll.u32 (!%p320_p9), %s359_s15, 4  ;;  %s683_s29 = sshll.u32 (!%p320_p9), %s871_s17, 4 }
  0x11   : > { %s361_s11 = scalar_lea.vmem (!%p320_p9), [#allocation2], %s673_s22  ;;  %s563_s18 = scalar_lea.sflag (!%p320_p9), [#allocation3], %s359_s15 }
  0x12   : > { %s579_s12 = sshll.u32 (!%p320_p9), %s361_s11, 4  ;;  %s749_s22 = scalar_lea.hbm (!%p320_p9), %s1158_s10, 32  ;;  %s580_s12 = int_to_ptr.vmem [resolvable:$true] %s579_s12 }
  0x14   : > { %v392_v0 = vld [vmem:[%s1149_s1 + $0x78] sm:$0xff]  ;;  %v391_v1 = vld [vmem:[%s1149_s1 + $0x70] sm:$0xff]  ;;  %v390_v2 = vld [vmem:[%s1149_s1 + $0x68] sm:$0xff]  ;;  %s1170_s25 = smov (!%p363_p10, %s674_s25), 3 }
  0x15   : > { %397 = vmatpush.msra.mxu0 %v392_v0  ;;  %v389_v3 = vld [vmem:[%s1149_s1 + $0x60] sm:$0xff]  ;;  %v388_v4 = vld [vmem:[%s1149_s1 + $0x58] sm:$0xff]  ;;  %v387_v5 = vld [vmem:[%s1149_s1 + $0x50] sm:$0xff]  ;;  %s675_s28 = sshll.u32 %s1170_s25, 3 }
  0x16   : > { %v437_v6 = vld [vmem:[%s1151_s3 + $0x78] sm:$0xff]  ;;  %v436_v7 = vld [vmem:[%s1151_s3 + $0x70] sm:$0xff]  ;;  %v386_v8 = vld [vmem:[%s1149_s1 + $0x48] sm:$0xff]  ;;  %s366_s27 = scalar_lea.vmem %s1148_s0, %s675_s28  ;;  %s372_s21 = scalar_lea.vmem %s1157_s9, %s675_s28 }
  0x17   : > { %398 = vmatpush.msra.mxu0 %v391_v1  ;;  %442 = vmatpush.msra.mxu1 %v437_v6  ;;  %v435_v9 = vld [vmem:[%s1151_s3 + $0x68] sm:$0xff]  ;;  %v385_v10 = vld [vmem:[%s1149_s1 + $0x40] sm:$0xff]  ;;  %v384_v12 = vld [vmem:[%s1149_s1 + $0x38] sm:$0xff]  ;;  %s578_s28 = scalar_lea.hbm %s1158_s10, %s683_s29 }
  0x18   : > { %v434_v11 = vld [vmem:[%s1151_s3 + $0x60] sm:$0xff]  ;;  %v433_v13 = vld [vmem:[%s1151_s3 + $0x58] sm:$0xff]  ;;  %v383_v14 = vld [vmem:[%s1149_s1 + $0x30] sm:$0xff] }
  0x19   : > { %399 = vmatpush.msra.mxu0 %v390_v2  ;;  %443 = vmatpush.msra.mxu1 %v436_v7  ;;  %v432_v15 = vld [vmem:[%s1151_s3 + $0x50] sm:$0xff]  ;;  %v382_v16 = vld [vmem:[%s1149_s1 + $0x28] sm:$0xff]  ;;  %v381_v18 = vld [vmem:[%s1149_s1 + $0x20] sm:$0xff] }
  0x1a   : > { %v431_v17 = vld [vmem:[%s1151_s3 + $0x48] sm:$0xff]  ;;  %v430_v19 = vld [vmem:[%s1151_s3 + $0x40] sm:$0xff]  ;;  %v380_v20 = vld [vmem:[%s1149_s1 + $0x18] sm:$0xff] }
  0x1b   : > { %400 = vmatpush.msra.mxu0 %v389_v3  ;;  %444 = vmatpush.msra.mxu1 %v435_v9  ;;  %v429_v21 = vld [vmem:[%s1151_s3 + $0x38] sm:$0xff]  ;;  %v379_v22 = vld [vmem:[%s1149_s1 + $0x10] sm:$0xff]  ;;  %v378_v24 = vld [vmem:[%s1149_s1 + $0x8] sm:$0xff] }
  0x1c   : > { %v428_v23 = vld [vmem:[%s1151_s3 + $0x30] sm:$0xff]  ;;  %v427_v25 = vld [vmem:[%s1151_s3 + $0x28] sm:$0xff]  ;;  %v377_v26 = vld [vmem:[%s1149_s1] sm:$0xff] }
  0x1d   : > { %401 = vmatpush.msra.mxu0 %v388_v4  ;;  %445 = vmatpush.msra.mxu1 %v434_v11  ;;  %v426_v27 = vld [vmem:[%s1151_s3 + $0x20] sm:$0xff]  ;;  %v425_v29 = vld [vmem:[%s1151_s3 + $0x18] sm:$0xff]  ;;  %v376_v30 = vld [vmem:[%s366_s27 + $0x8] sm:$0xff] }
  0x1e   : > { %v375_v28 = vld [vmem:[%s366_s27] sm:$0xff]  ;;  %v424_v31 = vld [vmem:[%s1151_s3 + $0x10] sm:$0xff]  ;;  %v423_v32 = vld [vmem:[%s1151_s3 + $0x8] sm:$0xff]  ;;  %s581_s27 = sshll.u32 %s578_s28, 4  ;;  %s582_s27 = int_to_ptr.hbm [resolvable:$true] %s581_s27 }
  0x1f   : > { %402 = vmatpush.msra.mxu0 %v387_v5  ;;  %446 = vmatpush.msra.mxu1 %v433_v13  ;;  %v422_v33 = vld [vmem:[%s1151_s3] sm:$0xff]  ;;  %v482_v34 = vld [vmem:[%s1153_s5 + $0x78] sm:$0xff]  ;;  %v481_v35 = vld [vmem:[%s1153_s5 + $0x70] sm:$0xff]  ;;  %s743_s20 = sshra.s32 %s582_s27, 4  ;;  %s744_s20 = int_to_ptr.hbm [resolvable:$true] %s743_s20 }
  0x20   : > { %487 = vmatpush.msra.mxu2 %v482_v34  ;;  %v480_v36 = vld [vmem:[%s1153_s5 + $0x68] sm:$0xff]  ;;  %v479_v37 = vld [vmem:[%s1153_s5 + $0x60] sm:$0xff]  ;;  %v478_v38 = vld [vmem:[%s1153_s5 + $0x58] sm:$0xff]  ;;  %s745_s17 = scalar_lea.hbm %s744_s20, 16  ;;  %p750_p0 = scmp.lt.s32.totalorder %s744_s20, %s1158_s10 }
  0x21   : > { %403 = vmatpush.msra.mxu0 %v386_v8  ;;  %447 = vmatpush.msra.mxu1 %v432_v15  ;;  %v477_v39 = vld [vmem:[%s1153_s5 + $0x50] sm:$0xff]  ;;  %v476_v40 = vld [vmem:[%s1153_s5 + $0x48] sm:$0xff]  ;;  %v475_v41 = vld [vmem:[%s1153_s5 + $0x40] sm:$0xff]  ;;  %p746_p11 = scmp.ne.s32.totalorder %s744_s20, %s745_s17  ;;  %p751_p1 = scmp.lt.s32.totalorder %s749_s22, %s745_s17 }
  0x22   : > { %488 = vmatpush.msra.mxu2 %v481_v35  ;;  %v474_v42 = vld [vmem:[%s1153_s5 + $0x38] sm:$0xff]  ;;  %v725_v43 = vld [vmem:[%s1150_s2] ss:$0 sm:$0xff]  ;;  %v473_v44 = vld [vmem:[%s1153_s5 + $0x30] sm:$0xff] }
  0x23   : > { %404 = vmatpush.msra.mxu0 %v385_v10  ;;  %448 = vmatpush.msra.mxu1 %v431_v17  ;;  %v472_v45 = vld [vmem:[%s1153_s5 + $0x28] sm:$0xff]  ;;  %v471_v48 = vld [vmem:[%s1153_s5 + $0x20] sm:$0xff]  ;;  %v470_v50 = vld [vmem:[%s1153_s5 + $0x18] sm:$0xff]  ;;  %p747_p12 = pnand %p746_p11, %p888_p5  ;;  %p752_p2 = por %p751_p1, %p750_p0 }
  0x24   : > { %489 = vmatpush.msra.mxu2 %v480_v36  ;;  %v469_v51 = vld [vmem:[%s1153_s5 + $0x10] sm:$0xff]  ;;  %v468_v55 = vld [vmem:[%s1153_s5 + $0x8] sm:$0xff]  ;;  %v467_v56 = vld [vmem:[%s1153_s5] sm:$0xff] }
  0x25   : > { %405 = vmatpush.msra.mxu0 %v384_v12  ;;  %449 = vmatpush.msra.mxu1 %v430_v19  ;;  %v527_v57 = vld [vmem:[%s1155_s7 + $0x78] sm:$0xff]  ;;  %v526_v58 = vld [vmem:[%s1155_s7 + $0x70] sm:$0xff]  ;;  %v525_v59 = vld [vmem:[%s1155_s7 + $0x68] sm:$0xff]  ;;  %p748_p13 = pneg %p747_p12 }
  0x26   : > { %490 = vmatpush.msra.mxu2 %v479_v37  ;;  %532 = vmatpush.msra.mxu3 %v527_v57  ;;  %v524_v60 = vld [vmem:[%s1155_s7 + $0x60] sm:$0xff]  ;;  %v523_v61 = vld [vmem:[%s1155_s7 + $0x58] sm:$0xff]  ;;  %v522_v62 = vld [vmem:[%s1155_s7 + $0x50] sm:$0xff] }
  0x27   : > { %406 = vmatpush.msra.mxu0 %v383_v14  ;;  %450 = vmatpush.msra.mxu1 %v429_v21  ;;  %v521_v63 = vld [vmem:[%s1155_s7 + $0x48] sm:$0xff]  ;;  %v520_v0 = vld [vmem:[%s1155_s7 + $0x40] sm:$0xff]  ;;  %v519_v1 = vld [vmem:[%s1155_s7 + $0x38] sm:$0xff]  ;;  %p753_p3 = pnand %p752_p2, %p748_p13 }
  0x28   : > { %491 = vmatpush.msra.mxu2 %v478_v38  ;;  %533 = vmatpush.msra.mxu3 %v526_v58  ;;  %v518_v2 = vld [vmem:[%s1155_s7 + $0x30] sm:$0xff]  ;;  %v726_v3 = vld [vmem:[%s1152_s4] ss:$0 sm:$0xff]  ;;  %v517_v4 = vld [vmem:[%s1155_s7 + $0x28] sm:$0xff] }
  0x29   : > { %407 = vmatpush.msra.mxu0 %v382_v16  ;;  %451 = vmatpush.msra.mxu1 %v428_v23  ;;  %v516_v5 = vld [vmem:[%s1155_s7 + $0x20] sm:$0xff]  ;;  %v515_v8 = vld [vmem:[%s1155_s7 + $0x18] sm:$0xff]  ;;  %v514_v11 = vld [vmem:[%s1155_s7 + $0x10] sm:$0xff] }
  0x2a   : > { %492 = vmatpush.msra.mxu2 %v477_v39  ;;  %534 = vmatpush.msra.mxu3 %v525_v59  ;;  %v513_v12 = vld [vmem:[%s1155_s7 + $0x8] sm:$0xff]  ;;  %v512_v13 = vld [vmem:[%s1155_s7] sm:$0xff] }
  0x2b   : > { %408 = vmatpush.msra.mxu0 %v381_v18  ;;  %452 = vmatpush.msra.mxu1 %v427_v25  ;;  %v727_v14 = vld [vmem:[%s1154_s6] ss:$0 sm:$0xff] }
  0x2c   : > { %493 = vmatpush.msra.mxu2 %v476_v40  ;;  %535 = vmatpush.msra.mxu3 %v524_v60  ;;  %v728_v21 = vld [vmem:[%s1156_s8] ss:$0 sm:$0xff] }
  0x2d   : > { %409 = vmatpush.msra.mxu0 %v380_v20  ;;  %453 = vmatpush.msra.mxu1 %v426_v27 }
  0x2e   : > { %494 = vmatpush.msra.mxu2 %v475_v41  ;;  %536 = vmatpush.msra.mxu3 %v523_v61 }
  0x2f   : > { %410 = vmatpush.msra.mxu0 %v379_v22  ;;  %454 = vmatpush.msra.mxu1 %v425_v29 }
  0x30   : > { %495 = vmatpush.msra.mxu2 %v474_v42  ;;  %537 = vmatpush.msra.mxu3 %v522_v62 }
  0x31   : > { %411 = vmatpush.msra.mxu0 %v378_v24  ;;  %455 = vmatpush.msra.mxu1 %v424_v31 }
  0x32   : > { %496 = vmatpush.msra.mxu2 %v473_v44  ;;  %538 = vmatpush.msra.mxu3 %v521_v63 }
  0x33   : > { %412 = vmatpush.msra.mxu0 %v377_v26  ;;  %456 = vmatpush.msra.mxu1 %v423_v32 }
  0x34   : > { %413 = vmatmul.f32.vlgmr.msra.gmra.mxu0 %v375_v28  ;;  %497 = vmatpush.msra.mxu2 %v472_v45 }
  0x35   : > { %457 = vmatpush.msra.mxu1 %v422_v33  ;;  %539 = vmatpush.msra.mxu3 %v520_v0 }
  0x36   : > { %498 = vmatpush.msra.mxu2 %v471_v48 }
  0x37   : > { %540 = vmatpush.msra.mxu3 %v519_v1 }
  0x38   : > { %499 = vmatpush.msra.mxu2 %v470_v50 }
  0x39   : > { %541 = vmatpush.msra.mxu3 %v518_v2 }
  0x3a   : > { %500 = vmatpush.msra.mxu2 %v469_v51 }
  0x3b   : > { %542 = vmatpush.msra.mxu3 %v517_v4 }
  0x3c   : > { %416 = vmatmul.f32.gmra.mxu0 %v376_v30  ;;  %501 = vmatpush.msra.mxu2 %v468_v55 }
  0x3d   : > { %543 = vmatpush.msra.mxu3 %v516_v5 }
  0x3e   : > { %502 = vmatpush.msra.mxu2 %v467_v56 }
  0x3f   : > { %544 = vmatpush.msra.mxu3 %v515_v8 }
  0x41   : > { %545 = vmatpush.msra.mxu3 %v514_v11 }
  0x43   : > { %546 = vmatpush.msra.mxu3 %v513_v12 }
  0x45   : > { %547 = vmatpush.msra.mxu3 %v512_v13 }
  0xb1   : > { %v414_v46 = vpop.f32.mrf.mxu0 }
  0xb2   : > { %v415_v47 = vadd.f32 %v725_v43, %v414_v46 }
  0xb4   : > { %v420_v49 = vmax.f32 %v415_v47, 0.0 }
  0xb6   : > { %458 = vmatmul.f32.vlgmr.msra.gmra.mxu1 %v420_v49 }
  0xb9   : > { %v417_v52 = vpop.f32.mrf.mxu0 }
  0xba   : > { %v418_v53 = vadd.f32 %v725_v43, %v417_v52 }
  0xbc   : > { %v421_v54 = vmax.f32 %v418_v53, 0.0 }
  0xbe   : > { %461 = vmatmul.f32.gmra.mxu1 %v421_v54 }
 0x133   : > { %v459_v6 = vpop.f32.mrf.mxu1 }
 0x134   : > { %v460_v7 = vadd.f32 %v726_v3, %v459_v6 }
 0x136   : > { %465 = vst [vmem:[%s372_s21] sm:$0xff] %v460_v7  ;;  %503 = vmatmul.f32.vlgmr.msra.gmra.mxu2 %v460_v7 }
 0x13b   : > { %v462_v9 = vpop.f32.mrf.mxu1 }
 0x13c   : > { %v463_v10 = vadd.f32 %v726_v3, %v462_v9 }
 0x13e   : > { %466 = vst [vmem:[%s372_s21 + $0x8] sm:$0xff] %v463_v10  ;;  %506 = vmatmul.f32.gmra.mxu2 %v463_v10 }
 0x1b9   : > { %v504_v15 = vpop.f32.mrf.mxu2 }
 0x1ba   : > { %v505_v16 = vadd.f32 %v727_v14, %v504_v15 }
 0x1bc   : > { %v510_v17 = vmax.f32 %v505_v16, 0.0 }
 0x1be   : > { %548 = vmatmul.f32.vlgmr.msra.gmra.mxu3 %v510_v17 }
 0x1c1   : > { %v507_v18 = vpop.f32.mrf.mxu2 }
 0x1c2   : > { %v508_v19 = vadd.f32 %v727_v14, %v507_v18 }
 0x1c4   : > { %v511_v20 = vmax.f32 %v508_v19, 0.0 }
 0x1c6   : > { %551 = vmatmul.f32.gmra.mxu3 %v511_v20 }
 0x241   : > { %v549_v22 = vpop.f32.mrf.mxu3 }
 0x242   : > { %v550_v23 = vadd.f32 %v728_v21, %v549_v22 }
 0x244   : > { %555 = vst [vmem:[%s361_s11] sm:$0xff] %v550_v23 }
 0x249   : > { %v552_v24 = vpop.f32.mrf.mxu3 }
 0x24a   : > { %v553_v25 = vadd.f32 %v728_v21, %v552_v24 }
 0x24c   : > { %556 = vst [vmem:[%s361_s11 + $0x8] sm:$0xff] %v553_v25 }
 0x24d   : > { %756 = shalt.err (!%p753_p3)
}
 0x24e   : > { %s793_s15 = smov 128   ;;  %s794_s30 = smov 8  }
 0x24f   : > { %684 = dma.vmem_to_hbm [thread:$0]  (%p888_p5), %s580_s12, 256, %s582_s27, %s563_s18, %s793_s15, %s793_s15, %s794_s30  }
 0x250 PF: > { %p690_p4 = scmp.ge.s32.totalorder %s791_s16, 2  ;;  %s604_s28 = sand.u32 1, %s779_s13  }
 0x251   : > { %s605_s11 = scalar_lea.sflag [#allocation3], %s604_s28 }
 0x252   : > { %p687_p7 = pnand %p690_p4, %p892_p6 }
 0x254   : > { %p688_p8 = pneg %p687_p7 }
 0x256   : > { %774 = dma.done.wait (%p688_p8), %s605_s11, 256  }
 0x257   : > { %776 = vsyncadd (%p688_p8), %s605_s11, 4294967040  ;;  %s1164_s20 = sld [smem:[#allocation5_spill]]  ;;  %p21_p9 = scmp.ge.s32.totalorder %s875_s19, 4  }
 0x258   : > { %s1165_s15 = sld [smem:[#allocation6_spill]]  ;;  %s1166_s13 = smov %s783_s14 }
 0x259   : > { %s1168_s16 = smov %s875_s19  ;;  %23 = sbr.rel (!%p21_p9) target bundleno = 3 (0x3), region = 103 }
 0x25d   : > { %s1167_s14 = smov %s1164_s20 }
 0x25e   :  { %611 = vsyncpa [#allocation3], 1 }
 0x25f   :  { %613 = vsyncpa [#allocation3 + $0x1], 1 }

</bundles_post_ra>
